<compile_context>
chip_gen: v7x
topology: tpu7x:2x2x1
jax: 0.10.0
libtpu: 0.0.40
codegen_flags: <defaults>
</compile_context>

<pallas_src>
import functools

import jax
import jax.numpy as jnp
from jax import lax
from jax.experimental import pallas as pl
from jax.experimental.pallas import tpu as pltpu

_LANES = 128
_SUBLANES = 8


def _wsls_kernel(x_ref, t_ref, out_ref, *, smoothing, n_valid, tile_r, lanes,
                 needs_mask):
    """Per-tile weakly-supervised label-smoothing CE partial sums.

    x_ref:   (2, tile_r, lanes) logit planes (class 0 / class 1), native dtype
    t_ref:   (tile_r, lanes)    weak-supervision targets
    out_ref: (8, lanes) f32     lane-dense per-tile partial sums
    """
    x0 = x_ref[0].astype(jnp.float32)
    x1 = x_ref[1].astype(jnp.float32)
    t = t_ref[...].astype(jnp.float32)

    # 2-class log-softmax collapses to one stable softplus of the logit diff:
    #   lp0 = -softplus(d),  lp1 = d - softplus(d),  d = x1 - x0.
    # The module's class weights satisfy w0 + w1 == 1 for C == 2, hence
    #   loss = -(w0*lp0 + w1*lp1) = softplus(d) - w1 * d
    # with (y = floor(t); positives y == 1, weak negatives y == 0):
    #   w1 = s*t                for y == 0
    #   w1 = 1 + s/2 - s*t      for y == 1   (== 1 - s/2 when t == 1)
    # i.e. w1 = s*t + y * ((1 + s/2) - 2*s*t).
    d = x1 - x0
    sp = jnp.maximum(d, 0.0) + jnp.log(1.0 + jnp.exp(-jnp.abs(d)))  # softplus

    y = jnp.floor(t)
    st = smoothing * t
    w1 = st + y * ((1.0 + 0.5 * smoothing) - (st + st))
    loss = sp - w1 * d                                   # (tile_r, lanes) f32

    def fold(v):
        # Fold to one (8, lanes) partial with pure vreg adds; the reshape is
        # tile-aligned (splits the sublane-major dim), so no VMEM relayout.
        return jnp.sum(v.reshape(tile_r // _SUBLANES, _SUBLANES, lanes), axis=0)

    if not needs_mask:
        # N fills the grid exactly: no tail mask anywhere (static fast path).
        out_ref[...] = fold(loss)
    else:
        i = pl.program_id(0)
        last = pl.num_programs(0) - 1

        @pl.when(i != last)
        def _():  # interior tiles: unmasked fast path
            out_ref[...] = fold(loss)

        @pl.when(i == last)
        def _():  # ragged tail: mask only here
            # Example index of each (row, lane) element.  int32 is fine for
            # any practical N (< 2^31 examples).
            row = lax.broadcasted_iota(jnp.int32, (tile_r, lanes), 0)
            lane = lax.broadcasted_iota(jnp.int32, (tile_r, lanes), 1)
            idx = (i * tile_r + row) * lanes + lane
            # Select (not multiply): any garbage / NaN read past N is dropped.
            out_ref[...] = fold(jnp.where(idx < n_valid, loss, 0.0))


def weakly_supervised_label_smoothing_ce(inputs, target, smoothing=0.1,
                                         tile_rows=2048):
    """inputs: (N, 2) logits (any float dtype; bf16 stays bf16 until the
    in-kernel cast); target: (N,) float labels (1.0 for positives,
    0 <= t < 1 for weak negatives).  Returns the scalar mean loss."""
    n, c = inputs.shape
    if c != 2:
        # The module's `scatter_(-1, 1 - one_hot_target, 1)` implies the
        # binary BERT-ranker convention; this kernel is specialized to C == 2.
        raise ValueError(f"kernel is specialized to 2 classes, got C={c}")
    assert target.shape == (n,)

    rows = -(-n // _LANES)                      # ceil(N / 128) lane-dense rows
    n128 = rows * _LANES

    # tile_r: large enough to amortize the ~0.35us/grid-step overhead
    # (v5e/v6e want 2048+ rows), but capped so the grid has >= 4 steps whenever
    # N permits so v7x can shard the "parallel" axis across both TensorCores.
    tile_rows = max(_SUBLANES, (int(tile_rows) // _SUBLANES) * _SUBLANES)
    quarter = ((-(-rows // 4) + _SUBLANES - 1) // _SUBLANES) * _SUBLANES
    tile_r = max(_SUBLANES, min(tile_rows, quarter))
    num_tiles = -(-rows // tile_r)

    # Lane-dense relayout: (N, 2) -> two (rows, 128) planes (example index on
    # the sublane/lane axes, so no 2-wide class axis wasting lanes).  The
    # transpose is the single unavoidable copy; the <=127-element pad (only
    # when N % 128 != 0) fuses into it, and the target reshape is a free
    # bitcast when no pad is needed.  The grid itself may be ragged: the final
    # block's out-of-bounds reads are discarded by the in-kernel select.
    # TODO(synk): for very large N the transpose copy could also be removed by
    # deinterleaving the (N, 2) buffer in-kernel with pltpu.roll; not taken
    # here per the review caveat (targets would need matching realignment).
    if n128 == n:
        x = inputs.T.reshape(2, rows, _LANES)
        t = target.reshape(rows, _LANES)
    else:
        x = jnp.pad(inputs, ((0, n128 - n), (0, 0))).T.reshape(2, rows, _LANES)
        t = jnp.pad(target, (0, n128 - n)).reshape(rows, _LANES)

    needs_mask = n != num_tiles * tile_r * _LANES

    partials = pl.pallas_call(
        functools.partial(
            _wsls_kernel,
            smoothing=float(smoothing),
            n_valid=n,
            tile_r=tile_r,
            lanes=_LANES,
            needs_mask=needs_mask,
        ),
        out_shape=jax.ShapeDtypeStruct((num_tiles * _SUBLANES, _LANES),
                                       jnp.float32),
        grid=(num_tiles,),
        in_specs=[
            pl.BlockSpec((2, tile_r, _LANES), lambda i: (0, i, 0)),
            pl.BlockSpec((tile_r, _LANES), lambda i: (i, 0)),
        ],
        out_specs=pl.BlockSpec((_SUBLANES, _LANES), lambda i: (i, 0)),
        compiler_params=pltpu.CompilerParams(
            dimension_semantics=("parallel",),
            vmem_limit_bytes=32 * 1024 * 1024,
        ),
    )(x, t)

    # Single final reduce + mean over the true (unpadded) example count.
    return jnp.sum(partials) / n


def _reference(inputs, target, smoothing=0.1):
    """Pure-JAX reference mirroring the PyTorch forward, for validation."""
    n, c = inputs.shape
    log_prob = jax.nn.log_softmax(inputs.astype(jnp.float32), axis=-1)
    y = target.astype(jnp.int32)
    one_hot = jax.nn.one_hot(y, c, dtype=jnp.float32)
    one_hot_other = jax.nn.one_hot(1 - y, c, dtype=jnp.float32)
    w_rel = (y.astype(jnp.float32) / c)[:, None] * jnp.ones((n, c), jnp.float32)
    w_weak = one_hot_other * (target - y.astype(jnp.float32))[:, None]
    w_weak_pos = one_hot * (1.0 - target)[:, None]
    w_ws = w_rel + w_weak + w_weak_pos
    weight = (1.0 - smoothing) * one_hot + smoothing * w_ws
    return jnp.mean(jnp.sum(-weight * log_prob, axis=-1))


if __name__ == "__main__":
    key = jax.random.PRNGKey(0)
    k_in1, k_neg1, k_in2, k_neg2 = jax.random.split(key, 4)

    # Case 1 (f32): N not a multiple of 128 -> exercises the pad + ragged-tail
    # path and a 2-step grid (interior fast path + last-tile mask branch).
    N1 = 2000
    inputs1 = jax.random.normal(k_in1, (N1, 2), dtype=jnp.float32)
    neg1 = jax.random.uniform(k_neg1, (N1 - N1 // 2,), minval=0.0, maxval=0.9)
    target1 = jnp.concatenate(
        [jnp.ones((N1 // 2,), jnp.float32), neg1.astype(jnp.float32)]
    )
    loss1 = weakly_supervised_label_smoothing_ce(inputs1, target1, smoothing=0.1)
    jax.block_until_ready(loss1)
    ref1 = _reference(inputs1, target1, smoothing=0.1)
    assert jnp.allclose(loss1, ref1, atol=1e-5, rtol=1e-5), (loss1, ref1)

    # Case 2 (bf16 logits): N a multiple of the full grid -> exercises the
    # pad-free, mask-free static path and native-dtype (bf16) ingestion.
    N2 = 1024
    inputs2 = jax.random.normal(k_in2, (N2, 2), dtype=jnp.bfloat16)
    neg2 = jax.random.uniform(k_neg2, (N2 - N2 // 2,), minval=0.0, maxval=0.9)
    target2 = jnp.concatenate(
        [jnp.ones((N2 // 2,), jnp.float32), neg2.astype(jnp.float32)]
    )
    loss2 = weakly_supervised_label_smoothing_ce(inputs2, target2, smoothing=0.1)
    jax.block_until_ready(loss2)
    ref2 = _reference(inputs2.astype(jnp.float32), target2, smoothing=0.1)
    assert jnp.allclose(loss2, ref2, atol=1e-4, rtol=1e-4), (loss2, ref2)

    print("KERNEL_OK")
</pallas_src>

<mosaic_0001>
module attributes {stable_mosaic.version = 11 : i64} {
  func.func @_wsls_kernel(%arg0: i32, %arg1: memref<2x8x128xf32, #tpu.memory_space<vmem>>, %arg2: memref<8x128xf32, #tpu.memory_space<vmem>>, %arg3: memref<8x128xf32, #tpu.memory_space<vmem>>) attributes {dimension_semantics = [#tpu.dimension_semantics<parallel>], iteration_bounds = array<i64: 2>, scalar_prefetch = 0 : i64, scratch_operands = 0 : i64, tpu.core_type = #tpu.core_type<tc>, window_params = [{transform_indices = @transform_0, window_bounds = array<i64: 2, 8, 128>}, {transform_indices = @transform_1, window_bounds = array<i64: 8, 128>}, {transform_indices = @transform_2, window_bounds = array<i64: 8, 128>}]} {
    %c0 = arith.constant 0 : index
    %c0_0 = arith.constant 0 : index
    %c0_1 = arith.constant 0 : index
    %0 = vector.load %arg1[%c0, %c0_0, %c0_1] : memref<2x8x128xf32, #tpu.memory_space<vmem>>, vector<1x8x128xf32>
    %1 = vector.shape_cast %0 : vector<1x8x128xf32> to vector<8x128xf32>
    %c1 = arith.constant 1 : index
    %c0_2 = arith.constant 0 : index
    %c0_3 = arith.constant 0 : index
    %2 = vector.load %arg1[%c1, %c0_2, %c0_3] : memref<2x8x128xf32, #tpu.memory_space<vmem>>, vector<1x8x128xf32>
    %3 = vector.shape_cast %2 : vector<1x8x128xf32> to vector<8x128xf32>
    %c0_4 = arith.constant 0 : index
    %c0_5 = arith.constant 0 : index
    %4 = vector.load %arg2[%c0_4, %c0_5] : memref<8x128xf32, #tpu.memory_space<vmem>>, vector<8x128xf32>
    %5 = arith.subf %3, %1 : vector<8x128xf32>
    %cst = arith.constant 0.000000e+00 : f32
    %6 = vector.broadcast %cst : f32 to vector<8x128xf32>
    %7 = arith.maximumf %5, %6 : vector<8x128xf32>
    %8 = math.absf %5 : vector<8x128xf32>
    %cst_6 = arith.constant 0.000000e+00 : f32
    %9 = vector.broadcast %cst_6 : f32 to vector<8x128xf32>
    %10 = arith.subf %9, %8 : vector<8x128xf32>
    %11 = math.exp %10 : vector<8x128xf32>
    %cst_7 = arith.constant 1.000000e+00 : f32
    %12 = vector.broadcast %cst_7 : f32 to vector<8x128xf32>
    %13 = arith.addf %12, %11 : vector<8x128xf32>
    %14 = math.log %13 : vector<8x128xf32>
    %15 = arith.addf %7, %14 : vector<8x128xf32>
    %16 = math.floor %4 : vector<8x128xf32>
    %cst_8 = arith.constant 1.000000e-01 : f32
    %17 = vector.broadcast %cst_8 : f32 to vector<8x128xf32>
    %18 = arith.mulf %17, %4 : vector<8x128xf32>
    %19 = arith.addf %18, %18 : vector<8x128xf32>
    %cst_9 = arith.constant 1.050000e+00 : f32
    %20 = vector.broadcast %cst_9 : f32 to vector<8x128xf32>
    %21 = arith.subf %20, %19 : vector<8x128xf32>
    %22 = arith.mulf %16, %21 : vector<8x128xf32>
    %23 = arith.addf %18, %22 : vector<8x128xf32>
    %24 = arith.mulf %23, %5 : vector<8x128xf32>
    %25 = arith.subf %15, %24 : vector<8x128xf32>
    %c1_i32 = arith.constant 1 : i32
    %26 = arith.cmpi ne, %arg0, %c1_i32 : i32
    %27 = arith.extui %26 : i1 to i32
    %c0_i32 = arith.constant 0 : i32
    %28 = arith.cmpi ne, %27, %c0_i32 : i32
    scf.if %28 {
      %32 = vector.shape_cast %25 : vector<8x128xf32> to vector<1x8x128xf32>
      %cst_12 = arith.constant dense<0.000000e+00> : vector<8x128xf32>
      %33 = vector.multi_reduction <add>, %32, %cst_12 [0] : vector<1x8x128xf32> to vector<8x128xf32>
      %c0_13 = arith.constant 0 : index
      %c0_14 = arith.constant 0 : index
      %34 = vector.load %arg3[%c0_13, %c0_14] : memref<8x128xf32, #tpu.memory_space<vmem>>, vector<8x128xf32>
      tpu.vector_store %arg3[%c0_13, %c0_14], %33 {strides = array<i32>} : memref<8x128xf32, #tpu.memory_space<vmem>>, vector<8x128xf32>,
    } else {
    }
    %c1_i32_10 = arith.constant 1 : i32
    %29 = arith.cmpi eq, %arg0, %c1_i32_10 : i32
    %30 = arith.extui %29 : i1 to i32
    %c0_i32_11 = arith.constant 0 : i32
    %31 = arith.cmpi ne, %30, %c0_i32_11 : i32
    scf.if %31 {
      %32 = tpu.iota {dimensions = array<i32: 0>} : vector<8x128xi32>
      %33 = tpu.iota {dimensions = array<i32: 1>} : vector<8x128xi32>
      %c8_i32 = arith.constant 8 : i32
      %34 = arith.muli %arg0, %c8_i32 : i32
      %35 = vector.broadcast %34 : i32 to vector<8x128xi32>
      %36 = arith.addi %35, %32 : vector<8x128xi32>
      %c128_i32 = arith.constant 128 : i32
      %37 = vector.broadcast %c128_i32 : i32 to vector<8x128xi32>
      %38 = arith.muli %36, %37 : vector<8x128xi32>
      %39 = arith.addi %38, %33 : vector<8x128xi32>
      %c2000_i32 = arith.constant 2000 : i32
      %40 = vector.broadcast %c2000_i32 : i32 to vector<8x128xi32>
      %41 = arith.cmpi slt, %39, %40 : vector<8x128xi32>
      %cst_12 = arith.constant 0.000000e+00 : f32
      %42 = vector.broadcast %cst_12 : f32 to vector<8x128xf32>
      %43 = arith.select %41, %25, %42 : vector<8x128xi1>, vector<8x128xf32>
      %44 = vector.shape_cast %43 : vector<8x128xf32> to vector<1x8x128xf32>
      %cst_13 = arith.constant dense<0.000000e+00> : vector<8x128xf32>
      %45 = vector.multi_reduction <add>, %44, %cst_13 [0] : vector<1x8x128xf32> to vector<8x128xf32>
      %c0_14 = arith.constant 0 : index
      %c0_15 = arith.constant 0 : index
      %46 = vector.load %arg3[%c0_14, %c0_15] : memref<8x128xf32, #tpu.memory_space<vmem>>, vector<8x128xf32>
      tpu.vector_store %arg3[%c0_14, %c0_15], %45 {strides = array<i32>} : memref<8x128xf32, #tpu.memory_space<vmem>>, vector<8x128xf32>,
    } else {
    }
    return
  }
  func.func @transform_0(%arg0: i32) -> (i32, i32, i32) {
    %c0_i32 = arith.constant 0 : i32
    %c0_i32_0 = arith.constant 0 : i32
    %c0_i32_1 = arith.constant 0 : i32
    return %c0_i32, %arg0, %c0_i32_0 : i32, i32, i32
  }
  func.func @transform_1(%arg0: i32) -> (i32, i32) {
    %c0_i32 = arith.constant 0 : i32
    %c0_i32_0 = arith.constant 0 : i32
    return %arg0, %c0_i32 : i32, i32
  }
  func.func @transform_2(%arg0: i32) -> (i32, i32) {
    %c0_i32 = arith.constant 0 : i32
    %c0_i32_0 = arith.constant 0 : i32
    return %arg0, %c0_i32 : i32, i32
  }
}

</mosaic_0001>

<bundles_post_ra>
// kernel: tpu_custom_call.1
= control target key start
LH: loop header
LB: loop body
LE: loop exit
PB: predicated region body
PF: predicated region fallthrough
CT: control target
= control target key end

     0   :  { %7 = vsyncpa [#allocation3], 0  ;;  %s787_s0 = inlined_call_operand.hbm [shape: f32[2,16,128], index: 0, kind: input, shape index: {}]   ;;  %s788_s1 = inlined_call_operand.hbm [shape: f32[16,128], index: 1, kind: input, shape index: {}]   ;;  %s789_s2 = inlined_call_operand.hbm [shape: f32[16,128], index: 2, kind: output, shape index: {}]  }
   0x1   :  { %9 = vsyncpa [#allocation3 + $0x1], 0 }
   0x2   :  { %10 = vsyncpa [#allocation6], 0 }
   0x3   :  { %12 = vsyncpa [#allocation6 + $0x1], 0 }
   0x4   :  { %13 = vsyncpa [#allocation4], 0 }
   0x5   :  { %15 = vsyncpa [#allocation4 + $0x1], 0  ;;  %s580_s9 = smov 0   ;;  %s582_s10 = smov 0  }
   0x6   :  { %s584_s11 = smov 0   ;;  %s586_s12 = smov 0  }
   0x7 LB: > { %s601_s13 = sadd.s32 4294967295, %s557_s12   ;;  %s350_s14 = sadd.s32 4294967294, %s557_s12   ;;  %s557_s12 = sphi %s586_s12, %s809_s12   ;;  %s553_s11 = sphi %s584_s11, %s808_s11   ;;  %s549_s10 = sphi %s582_s10, %s807_s10   ;;  %s545_s9 = sphi %s580_s9, %s806_s9  }
   0x8   : > { %s605_s15 = sadd.s32 1, %s557_s12   ;;  %s28_s16 = sadd.s32 1, %s553_s11 }
   0x9   : > { %s25_s17 = ssub.s32 %s557_s12, %s605_s15  ;;  %p35_p0 = scmp.ne.s32.totalorder %s553_s11, %s549_s10 }
   0xa   : > { %p26_p1 = scmp.eq.s32.totalorder %s25_s17, 0  ;;  %p36_p2 = scmp.eq.s32.totalorder %s557_s12, 0 }
   0xb   : > { %p41_p3 = scmp.ne.s32.totalorder %s549_s10, %s545_s9  ;;  %p42_p4 = scmp.eq.s32.totalorder %s601_s13, 0 }
   0xc   : > { %s617_s18 = scalar_select %p26_p1, %s553_s11, %s28_s16  }
   0xd   : > { %p619_p5 = por %p36_p2, %p35_p0  ;;  %p623_p6 = por %p42_p4, %p41_p3 }
   0xe   : > { %p790_p7 = scmp.eq.s32.totalorder %s601_s13, 1  ;;  %p97_p8 = scmp.eq.s32.totalorder %s350_s14, 1 }
   0xf   : > { %s794_s20 = scalar_select %p623_p6, 1, 0 }
  0x10   : > { %p386_p10 = scmp.lt.s32.totalorder %s557_s12, 2  ;;  %p632_p11 = por %p790_p7, %p35_p0 }
  0x11   : > { %p636_p12 = por %p97_p8, %p41_p3  ;;  %s641_s23 = sand.u32 1, %s553_s11  }
  0x12   : > { %s795_s21 = scalar_select %p632_p11, 1, 0 }
  0x13   : > { %s796_s22 = scalar_select %p636_p12, 1, 0 }
  0x14   : > { %s354_s24 = sshll.u32 %s557_s12, 7  ;;  %s353_s25 = sshll.u32 %s641_s23, 4 }
  0x15   : > { %s650_s28 = scalar_lea.hbm %s787_s0, %s354_s24  ;;  %s121_s29 = scalar_lea.vmem [#allocation2], %s353_s25 }
  0x16   : > { %s127_s30 = sshll.u32 %s121_s29, 4  ;;  %p654_p13 = pnand %p386_p10, %p619_p5  ;;  %s658_s30 = int_to_ptr.vmem [resolvable:$true] %s127_s30 }
  0x17   : > { %s118_s4 = scalar_lea.sflag [#allocation3], %s641_s23  ;;  %s427_s5 = scalar_lea.hbm %s650_s28, 256 }
  0x18   : > { %p428_p1 = scmp.ne.s32.totalorder %s650_s28, %s427_s5  ;;  %p429_p2 = pneg %p654_p13 }
  0x19   : > { %s432_s8 = scalar_lea.hbm %s787_s0, 512  ;;  %p433_p5 = scmp.lt.u32.totalorder %s650_s28, %s787_s0 }
  0x1a   : > { %p430_p3 = pnand %p429_p2, %p428_p1  ;;  %p434_p8 = scmp.lt.u32.totalorder %s432_s8, %s427_s5 }
  0x1b   : > { %p436_p9 = scmp.lt.u32.totalorder %s427_s5, %s650_s28 }
  0x1c   : > { %p431_p4 = pneg %p430_p3  ;;  %p435_p10 = por %p434_p8, %p433_p5 }
  0x1e   : > { %p437_p7 = por %p436_p9, %p435_p10 }
  0x20   : > { %p438_p0 = pnand %p437_p7, %p431_p4 }
  0x22   : > { %441 = shalt.err (!%p438_p0)
}
  0x23   : > { %s442_s17 = scalar_lea.vmem %s658_s30, 256  ;;  %s559_s19 = smov [#allocation2]  }
  0x24   : > { %p443_p1 = scmp.ne.s32.totalorder %s658_s30, %s442_s17  ;;  %s447_s25 = sshll.u32 %s559_s19, 4  ;;  %s448_s25 = int_to_ptr.vmem [resolvable:$false] %s447_s25 }
  0x25   : > { %s449_s26 = scalar_lea.vmem %s448_s25, 512  ;;  %p450_p11 = scmp.lt.s32.totalorder %s658_s30, %s448_s25 }
  0x26   : > { %p445_p3 = pnand %p443_p1, %p429_p2  ;;  %p451_p5 = scmp.lt.s32.totalorder %s449_s26, %s442_s17 }
  0x28   : > { %p446_p12 = pneg %p445_p3  ;;  %p452_p8 = por %p451_p5, %p450_p11 }
  0x2a   : > { %p453_p9 = pnand %p452_p8, %p446_p12 }
  0x2c   : > { %456 = shalt.err (!%p453_p9)
}
  0x2d   : > { %s560_s27 = smov 256   ;;  %s561_s29 = smov 128  }
  0x2e   : > { %s562_s5 = smov 8   ;;  %p153_p7 = scmp.lt.s32.totalorder %s557_s12, 3 }
  0x2f   : > { %378 = dma.hbm_to_vmem [thread:$0]  (!%p654_p13), %s650_s28, 256, %s658_s30, %s118_s4, %s560_s27, %s561_s29, %s562_s5  }
  0x30   : > { %s355_s6 = sshll.u32 %s641_s23, 3  ;;  %s696_s14 = scalar_lea.hbm %s788_s1, %s354_s24 }
  0x31   : > { %p798_p11 = scmp.ge.s32.totalorder %s557_s12, 1  ;;  %s141_s17 = scalar_lea.vmem [#allocation5], %s355_s6 }
  0x32   : > { %s148_s19 = sshll.u32 %s141_s17, 4  ;;  %s138_s28 = scalar_lea.sflag [#allocation6], %s641_s23  ;;  %s149_s19 = int_to_ptr.vmem [resolvable:$true] %s148_s19 }
  0x33   : > { %p700_p12 = pnand %p798_p11, %p153_p7  ;;  %s457_s30 = scalar_lea.hbm %s696_s14, 128 }
  0x34   : > { %p458_p0 = scmp.ne.s32.totalorder %s696_s14, %s457_s30  ;;  %s462_s25 = scalar_lea.hbm %s788_s1, 256 }
  0x35   : > { %s799_s16 = scalar_select %p700_p12, 1, 0 }
  0x36   : > { %p460_p4 = pnand %p458_p0, %p429_p2  ;;  %p463_p1 = scmp.lt.u32.totalorder %s696_s14, %s788_s1 }
  0x37   : > { %p464_p3 = scmp.lt.u32.totalorder %s462_s25, %s457_s30  ;;  %p466_p8 = scmp.lt.u32.totalorder %s457_s30, %s696_s14 }
  0x38   : > { %p461_p10 = pneg %p460_p4 }
  0x39   : > { %p465_p5 = por %p464_p3, %p463_p1 }
  0x3b   : > { %p467_p9 = por %p466_p8, %p465_p5 }
  0x3d   : > { %p468_p7 = pnand %p467_p9, %p461_p10 }
  0x3f   : > { %471 = shalt.err (!%p468_p7)
}
  0x40   : > { %s472_s23 = scalar_lea.vmem %s149_s19, 128  ;;  %s563_s29 = smov [#allocation5]  }
  0x41   : > { %p473_p11 = scmp.ne.s32.totalorder %s149_s19, %s472_s23  ;;  %s477_s5 = sshll.u32 %s563_s29, 4  ;;  %s478_s5 = int_to_ptr.vmem [resolvable:$false] %s477_s5 }
  0x42   : > { %s479_s6 = scalar_lea.vmem %s478_s5, 256  ;;  %p480_p6 = scmp.lt.s32.totalorder %s149_s19, %s478_s5 }
  0x43   : > { %p475_p0 = pnand %p473_p11, %p429_p2  ;;  %p481_p12 = scmp.lt.s32.totalorder %s479_s6, %s472_s23 }
  0x45   : > { %p476_p4 = pneg %p475_p0  ;;  %p482_p1 = por %p481_p12, %p480_p6 }
  0x47   : > { %p483_p3 = pnand %p482_p1, %p476_p4 }
  0x49   : > { %486 = shalt.err (!%p483_p3)
}
  0x4a   : > { %381 = dma.hbm_to_vmem [thread:$0]  (!%p654_p13), %s696_s14, 128, %s149_s19, %s138_s28  }
  0x4b   : > { %p800_p10 = scmp.ne.s32.totalorder %s799_s16, 0 }
  0x4c   : > { %s727_s7 = sand.u32 (!%p800_p10), 1, %s549_s10   ;;  %p801_p2 = scmp.ne.s32.totalorder (!%p800_p10), %s794_s20, 0 }
  0x4d   : > { %157 = sbr.rel (%p800_p10) target bundleno = 167 (0xa7), region = 28  ;;  %s358_s8 = sshll.u32 (!%p800_p10), %s727_s7, 4 }
  0x4e   : > { %s160_s17 = scalar_lea.sflag (!%p800_p10), [#allocation3], %s727_s7  ;;  %s163_s30 = scalar_lea.vmem (!%p800_p10), [#allocation2], %s358_s8 }
  0x54   : > { %532 = dma.done.wait (%p801_p2), %s160_s17, 256  }
  0x55   : > { %534 = vsyncadd (%p801_p2), %s160_s17, 4294967040  ;;  %s359_s3 = sshll.u32 %s727_s7, 3  ;;  %s169_s14 = scalar_lea.sflag [#allocation6], %s727_s7 }
  0x56   : > { %s172_s16 = scalar_lea.vmem [#allocation5], %s359_s3 }
  0x57   : > { %536 = dma.done.wait (%p801_p2), %s169_s14, 128  }
  0x58   : > { %538 = vsyncadd (%p801_p2), %s169_s14, 4294967168  ;;  %v198_v0 = vld [vmem:[%s163_s30] sm:$0xff]  ;;  %v361_v1 = vld [vmem:[%s163_s30 + $0x8] sm:$0xff]  ;;  %s197_s20 = scalar_lea.vmem [#allocation7], %s359_s3  ;;  %p802_p6 = scmp.eq.s32.totalorder %s601_s13, 1 }
  0x59   : > { %v202_v2 = vsub.f32 %v361_v1, %v198_v0  ;;  %v201_v6 = vld [vmem:[%s172_s16] sm:$0xff] }
  0x5a   : > { %v213_v7 = vmul.f32 0.1, %v201_v6  ;;  %v212_v11 = vfloor.f32 %v201_v6 }
  0x5b   : > { %v204_v3 = vand.u32 2147483647, %v202_v2  ;;  %v203_v15 = vmax.f32 %v202_v2, 0.0 }
  0x5c   : > { %v214_v8 = vadd.f32 %v213_v7, %v213_v7 }
  0x5d   : > { %v205_v4 = vsub.f32 0.0, %v204_v3 }
  0x5e   : > { %v215_v12 = vsub.f32 1.05, %v214_v8 }
  0x5f   : > { %v206_v5 = vmul.f32 1.442695, %v205_v4 }
  0x60   : > { %v216_v13 = vmul.f32 %v215_v12, %v212_v11 }
  0x61   : > { %423 = vpow2.f32 %v206_v5 }
  0x62   : > { %v217_v14 = vadd.f32 %v216_v13, %v213_v7 }
  0x64   : > { %v218_v18 = vmul.f32 %v217_v14, %v202_v2 }
  0x6b   : > { %v424_v9 = vpop.eup %423 }
  0x6c   : > { %v208_v10 = vadd.f32 1.0, %v424_v9 }
  0x6e   : > { %425 = vlog2.f32 %v208_v10 }
  0x77   : > { %223 = sbr.rel (%p802_p6) target bundleno = 128 (0x80), region = 40 }
  0x78   : > { %v426_v16 = vpop.eup %425 }
  0x79   : > { %v210_v17 = vmul.f32 0.6931472, %v426_v16 }
  0x7b   : > { %v211_v19 = vadd.f32 %v210_v17, %v203_v15 }
  0x7d   : > { %v219_v20 = vsub.f32 %v211_v19, %v218_v18 }
  0x7f   : > { %225 = vst [vmem:[%s197_s20] sm:$0xff] %v219_v20 }
  0x80 PF: > { %p363_p13 = scmp.ne.s32.totalorder %s601_s13, 1 }
  0x81   : > { %v230_v21 = vlaneseq (!%p363_p13)  ;;  %s364_s19 = sshll.u32 (!%p363_p13), %s601_s13, 3 }
  0x82   : > { %229 = sbr.rel (%p363_p13) target bundleno = 142 (0x8e), region = 44  ;;  %v235_v22 = vstv (!%p363_p13), %s364_s19 }
  0x83   : > { %v231_v23 = vshrl.u32 (!%p363_p13), %v230_v21, 7  ;;  %v233_v24 = vand.u32 (!%p363_p13), 127, %v230_v21 }
  0x85   : > { %v236_v25 = vadd.s32 (!%p363_p13), %v235_v22, %v231_v23 }
  0x87   : > { %v237_v26 = vmul.u32 (!%p363_p13), 128, %v236_v25 }
  0x89   : > { %v238_v27 = vadd.s32 %v237_v26, %v233_v24 }
  0x8b   : > { %vm239_vm0 = vcmp.lt.s32.totalorder %v238_v27, 2000 }
  0x8c   : > { %v240_v28 = vsel %vm239_vm0, %v219_v20, 0.0 }
  0x8d   : > { %242 = vst [vmem:[%s197_s20] sm:$0xff] %v240_v28 }
  0x8e PF: > { %s366_s28 = sshll.u32 %s601_s13, 7  ;;  %s257_s26 = sshll.u32 %s197_s20, 4  ;;  %s258_s26 = int_to_ptr.vmem [resolvable:$true] %s257_s26 }
  0x8f   : > { %s749_s25 = scalar_lea.hbm %s789_s2, %s366_s28  ;;  %s244_s27 = scalar_lea.sflag [#allocation4], %s727_s7 }
  0x90   : > { %s487_s23 = scalar_lea.vmem %s258_s26, 128  ;;  %p803_p5 = scmp.ne.s32.totalorder %s795_s21, 0 }
  0x91   : > { %p488_p12 = scmp.ne.s32.totalorder %s258_s26, %s487_s23  ;;  %s564_s29 = smov [#allocation7]  }
  0x92   : > { %s491_s5 = sshll.u32 %s564_s29, 4  ;;  %s492_s5 = int_to_ptr.vmem [resolvable:$false] %s491_s5 }
  0x93   : > { %p489_p8 = pnand %p488_p12, %p803_p5  ;;  %s493_s6 = scalar_lea.vmem %s492_s5, 256 }
  0x94   : > { %p494_p7 = scmp.lt.s32.totalorder %s258_s26, %s492_s5  ;;  %p495_p11 = scmp.lt.s32.totalorder %s493_s6, %s487_s23 }
  0x95   : > { %p490_p9 = pneg %p489_p8 }
  0x96   : > { %p496_p0 = por %p495_p11, %p494_p7 }
  0x98   : > { %p497_p4 = pnand %p496_p0, %p490_p9 }
  0x9a   : > { %500 = shalt.err (!%p497_p4)
}
  0x9b   : > { %s501_s13 = scalar_lea.hbm %s749_s25, 128  ;;  %s505_s17 = scalar_lea.hbm %s789_s2, 256 }
  0x9c   : > { %p502_p1 = scmp.ne.s32.totalorder %s749_s25, %s501_s13  ;;  %p506_p2 = scmp.lt.u32.totalorder %s749_s25, %s789_s2 }
  0x9d   : > { %p507_p6 = scmp.lt.u32.totalorder %s505_s17, %s501_s13  ;;  %p509_p12 = scmp.lt.u32.totalorder %s501_s13, %s749_s25 }
  0x9e   : > { %p503_p3 = pnand %p502_p1, %p803_p5 }
  0x9f   : > { %p508_p13 = por %p507_p6, %p506_p2 }
  0xa0   : > { %p504_p10 = pneg %p503_p3 }
  0xa1   : > { %p510_p8 = por %p509_p12, %p508_p13 }
  0xa3   : > { %p511_p9 = pnand %p510_p8, %p504_p10 }
  0xa5   : > { %514 = shalt.err (!%p511_p9)
}
  0xa6   : > { %373 = dma.vmem_to_hbm [thread:$0]  (%p803_p5), %s258_s26, 128, %s749_s25, %s244_s27  }
  0xa7 PF: > { %s269_s14 = sand.u32 1, %s545_s9   ;;  %p804_p7 = scmp.ne.s32.totalorder %s796_s22, 0 }
  0xa8   : > { %p805_p11 = scmp.ge.s32.totalorder %s557_s12, 2  ;;  %s270_s16 = scalar_lea.sflag [#allocation4], %s269_s14 }
  0xaa   : > { %p383_p0 = pnand %p805_p11, %p804_p7 }
  0xac   : > { %540 = dma.done.wait (!%p383_p0), %s270_s16, 128  }
  0xad   : > { %542 = vsyncadd (!%p383_p0), %s270_s16, 4294967168  ;;  %p18_p4 = scmp.ge.s32.totalorder %s605_s15, 4   ;;  %s806_s9 = smov %s549_s10 }
  0xae   : > { %s807_s10 = smov %s553_s11  ;;  %s808_s11 = smov %s617_s18 }
  0xaf   : > { %s809_s12 = smov %s605_s15  ;;  %20 = sbr.rel (!%p18_p4) target bundleno = 7 (0x7), region = 95 }
  0xb6   :  { %275 = vsyncpa [#allocation3], 1 }
  0xb7   :  { %277 = vsyncpa [#allocation3 + $0x1], 1 }
  0xb8   :  { %278 = vsyncpa [#allocation6], 1 }
  0xb9   :  { %280 = vsyncpa [#allocation6 + $0x1], 1 }
  0xba   :  { %281 = vsyncpa [#allocation4], 1 }
  0xbb   :  { %283 = vsyncpa [#allocation4 + $0x1], 1 }

</bundles_post_ra>
